<compile_context>
chip_gen: v7x
topology: tpu7x:2x2x1
jax: 0.10.0
libtpu: 0.0.40
codegen_flags: <defaults>
</compile_context>

<pallas_src>
import jax
import jax.numpy as jnp
from jax import lax
from jax.experimental import pallas as pl
from jax.experimental.pallas import tpu as pltpu


def _round_up(x, m):
    return (x + m - 1) // m * m


def _stats_kernel(patches_ref, w_ref, stats_ref):
    # patches_ref: (bm, K) | w_ref: (K, Npad) | stats_ref: (8, Npad)
    y = jnp.dot(patches_ref[...], w_ref[...], preferred_element_type=jnp.float32)
    s1 = jnp.sum(y, axis=0, keepdims=True)        # per-column sum
    s2 = jnp.sum(y * y, axis=0, keepdims=True)    # per-column sum of squares
    pad = jnp.zeros((6, y.shape[1]), jnp.float32)
    stats_ref[...] = jnp.concatenate([s1, s2, pad], axis=0)


def _apply_kernel(patches_ref, w_ref, scale_ref, shift_ref, o_ref):
    # Recompute y and fuse BN affine + ReLU; lane-dense (Npad multiple of 128) store.
    y = jnp.dot(patches_ref[...], w_ref[...], preferred_element_type=jnp.float32)
    o_ref[...] = jnp.maximum(y * scale_ref[...] + shift_ref[...], 0.0).astype(o_ref.dtype)


def up_conv_forward(x_nchw, weight, bias, gamma, beta, *,
                    eps=1e-5, block_m=512, compute_dtype=jnp.float32):
    """x_nchw: (N, Cin, H, W). weight: (Cout, Cin, 3, 3). Returns (N, Cout, 2H, 2W).

    `bias` is accepted for API parity but is mathematically cancelled by the
    training-mode BatchNorm mean subtraction, so it is not applied.
    On v6e, pass compute_dtype=jnp.bfloat16 to halve patch/weight HBM traffic
    (accumulation stays f32).
    """
    del bias  # exactly cancelled by BN mean subtraction
    n, cin, h, w = x_nchw.shape
    cout = weight.shape[0]
    k_dim = cin * 9
    cpad = _round_up(cout, 128)     # lane-dense channel padding
    npad = 4 * cpad                 # 4 phases x padded channels

    # --- glue: fold (nearest x2 upsample + 3x3 conv) into 4 phase filters over
    #     a 3x3 ORIGINAL-resolution neighborhood (each phase uses a 2x2 subset).
    wf = jnp.zeros((2, 2, cout, cin, 3, 3), jnp.float32)
    w32 = weight.astype(jnp.float32)
    for py in range(2):
        for px in range(2):
            for kh in range(3):
                for kw in range(3):
                    dy = (py + kh - 1) // 2 + 1   # source row offset + 1
                    dx = (px + kw - 1) // 2 + 1   # source col offset + 1
                    wf = wf.at[py, px, :, :, dy, dx].add(w32[:, :, kh, kw])
    # (K, 4, Cout) -> zero-pad channels to Cpad -> (K, Npad)
    w_mat = wf.transpose(3, 4, 5, 0, 1, 2).reshape(k_dim, 4, cout)
    w_mat = jnp.pad(w_mat, ((0, 0), (0, 0), (0, cpad - cout)))
    w_mat = w_mat.reshape(k_dim, npad).astype(compute_dtype)

    # --- glue: 9x im2col of the zero-padded ORIGINAL input (NOT the upsampled one).
    x_nhwc = x_nchw.transpose(0, 2, 3, 1).astype(jnp.float32)
    xp = jnp.pad(x_nhwc, ((0, 0), (1, 1), (1, 1), (0, 0)))
    cols = [xp[:, a:a + h, b:b + w, :] for a in range(3) for b in range(3)]
    patches = jnp.stack(cols, axis=-1)                       # (N, H, W, Cin, 9)
    m_rows = n * h * w
    patches = patches.reshape(m_rows, k_dim).astype(compute_dtype)

    bm = _round_up(max(8, min(block_m, _round_up(m_rows, 8))), 8)
    m_pad = _round_up(m_rows, bm)
    if m_pad != m_rows:
        # Zero rows contribute exactly zero to sum / sum-of-squares (no bias),
        # so batch statistics stay exact when divided by the true count.
        patches = jnp.pad(patches, ((0, m_pad - m_rows), (0, 0)))
    n_tiles = m_pad // bm

    itemsize = jnp.dtype(compute_dtype).itemsize
    cost = pl.CostEstimate(
        flops=2 * m_pad * k_dim * npad,
        transcendentals=0,
        bytes_accessed=(m_pad * k_dim * itemsize
                        + k_dim * npad * itemsize
                        + m_pad * npad * 4))

    # --- pass 1: per-tile partial sums / sums-of-squares of y = patches @ W ---
    stats = pl.pallas_call(
        _stats_kernel,
        out_shape=jax.ShapeDtypeStruct((n_tiles * 8, npad), jnp.float32),
        grid_spec=pltpu.PrefetchScalarGridSpec(
            num_scalar_prefetch=0,
            grid=(n_tiles,),
            in_specs=[
                pl.BlockSpec((bm, k_dim), lambda i: (i, 0)),
                pl.BlockSpec((k_dim, npad), lambda i: (0, 0)),
            ],
            out_specs=pl.BlockSpec((8, npad), lambda i: (i, 0)),
        ),
        compiler_params=pltpu.CompilerParams(
            dimension_semantics=("parallel",)),
        cost_estimate=cost,
    )(patches, w_mat)

    # --- tiny JAX combine: batch mean / biased var per output channel ---
    stats = stats.reshape(n_tiles, 8, 4, cpad)
    col_sum = stats[:, 0].sum(axis=0)[:, :cout]     # (4 phases, Cout)
    col_sq = stats[:, 1].sum(axis=0)[:, :cout]
    count = 4.0 * m_rows                            # N * 2H * 2W elems per channel
    mean = col_sum.sum(axis=0) / count
    var = jnp.maximum(col_sq.sum(axis=0) / count - mean * mean, 0.0)
    inv = lax.rsqrt(var + eps)
    scale_c = gamma.astype(jnp.float32) * inv
    shift_c = beta.astype(jnp.float32) - mean * scale_c
    scale_row = jnp.pad(scale_c.reshape(1, cout), ((0, 0), (0, cpad - cout)))
    shift_row = jnp.pad(shift_c.reshape(1, cout), ((0, 0), (0, cpad - cout)))
    scale_row = jnp.tile(scale_row, (1, 4))         # (1, Npad)
    shift_row = jnp.tile(shift_row, (1, 4))         # (1, Npad)

    # --- pass 2: recompute conv, fuse BN affine + ReLU ---
    out_flat = pl.pallas_call(
        _apply_kernel,
        out_shape=jax.ShapeDtypeStruct((m_pad, npad), jnp.float32),
        grid_spec=pltpu.PrefetchScalarGridSpec(
            num_scalar_prefetch=0,
            grid=(n_tiles,),
            in_specs=[
                pl.BlockSpec((bm, k_dim), lambda i: (i, 0)),
                pl.BlockSpec((k_dim, npad), lambda i: (0, 0)),
                pl.BlockSpec((1, npad), lambda i: (0, 0)),
                pl.BlockSpec((1, npad), lambda i: (0, 0)),
            ],
            out_specs=pl.BlockSpec((bm, npad), lambda i: (i, 0)),
        ),
        compiler_params=pltpu.CompilerParams(
            dimension_semantics=("parallel",)),
        cost_estimate=cost,
    )(patches, w_mat, scale_row, shift_row)

    # --- glue: interleave the 4 phases back to full resolution, return NCHW ---
    out = out_flat[:m_rows].reshape(n, h, w, 2, 2, cpad)[..., :cout]
    out = out.transpose(0, 1, 3, 2, 4, 5).reshape(n, 2 * h, 2 * w, cout)
    # TODO(synk): in a real network keep NHWC end-to-end; this transpose is
    # layout glue to match the PyTorch NCHW contract.
    return out.transpose(0, 3, 1, 2)


def _reference(x_nchw, weight, bias, gamma, beta, eps=1e-5):
    """Pure-JAX reference for sanity checking (matches the PyTorch module)."""
    x_up = jnp.repeat(jnp.repeat(x_nchw, 2, axis=2), 2, axis=3)
    y = lax.conv_general_dilated(
        x_up.astype(jnp.float32), weight.astype(jnp.float32),
        window_strides=(1, 1), padding=((1, 1), (1, 1)),
        dimension_numbers=("NCHW", "OIHW", "NCHW"))
    y = y + bias.reshape(1, -1, 1, 1)
    mean = jnp.mean(y, axis=(0, 2, 3), keepdims=True)
    var = jnp.mean((y - mean) ** 2, axis=(0, 2, 3), keepdims=True)
    y = (y - mean) * lax.rsqrt(var + eps)
    y = y * gamma.reshape(1, -1, 1, 1) + beta.reshape(1, -1, 1, 1)
    return jnp.maximum(y, 0.0)


if __name__ == "__main__":
    key = jax.random.PRNGKey(0)
    k_x, k_w, k_b, k_g, k_be = jax.random.split(key, 5)

    N, CH_IN, CH_OUT, H, W = 2, 4, 8, 16, 16

    x = jax.random.normal(k_x, (N, CH_IN, H, W), dtype=jnp.float32)
    weight = jax.random.normal(k_w, (CH_OUT, CH_IN, 3, 3), dtype=jnp.float32) * 0.1
    bias = jax.random.normal(k_b, (CH_OUT,), dtype=jnp.float32) * 0.1
    gamma = 1.0 + 0.1 * jax.random.normal(k_g, (CH_OUT,), dtype=jnp.float32)
    beta = 0.1 * jax.random.normal(k_be, (CH_OUT,), dtype=jnp.float32)

    # Small block_m so the toy shape still exercises a multi-step, pipelined grid.
    out = up_conv_forward(x, weight, bias, gamma, beta, block_m=128)
    out = jax.block_until_ready(out)

    ref = jax.block_until_ready(_reference(x, weight, bias, gamma, beta))
    assert out.shape == (N, CH_OUT, 2 * H, 2 * W)
    assert jnp.allclose(out, ref, rtol=1e-3, atol=1e-3)

    print("KERNEL_OK")
</pallas_src>

<mosaic_0001>
module attributes {stable_mosaic.version = 11 : i64} {
  func.func @_stats_kernel(%arg0: i32, %arg1: memref<128x36xf32, #tpu.memory_space<vmem>>, %arg2: memref<36x512xf32, #tpu.memory_space<vmem>>, %arg3: memref<8x512xf32, #tpu.memory_space<vmem>>) attributes {dimension_semantics = [#tpu.dimension_semantics<parallel>], iteration_bounds = array<i64: 4>, scalar_prefetch = 0 : i64, scratch_operands = 0 : i64, tpu.core_type = #tpu.core_type<tc>, window_params = [{transform_indices = @transform_0, window_bounds = array<i64: 128, 36>}, {pipeline_mode = #tpu.pipeline_mode<synchronous>, transform_indices = @transform_1, window_bounds = array<i64: 36, 512>}, {transform_indices = @transform_2, window_bounds = array<i64: 8, 512>}]} {
    %c0 = arith.constant 0 : index
    %c0_0 = arith.constant 0 : index
    %0 = vector.load %arg1[%c0, %c0_0] : memref<128x36xf32, #tpu.memory_space<vmem>>, vector<128x36xf32>
    %c0_1 = arith.constant 0 : index
    %c0_2 = arith.constant 0 : index
    %1 = vector.load %arg2[%c0_1, %c0_2] : memref<36x512xf32, #tpu.memory_space<vmem>>, vector<36x512xf32>
    %cst = arith.constant dense<0.000000e+00> : vector<128x512xf32>
    %2 = tpu.matmul %0, %1, %cst {dimension_numbers = #tpu.dot_dimension_numbers<[1], [0], [0], [1], [0, 0, 1, 1], [], []>} : vector<128x36xf32>, vector<36x512xf32>, vector<128x512xf32> -> vector<128x512xf32>
    %cst_3 = arith.constant dense<0.000000e+00> : vector<512xf32>
    %3 = vector.multi_reduction <add>, %2, %cst_3 [0] : vector<128x512xf32> to vector<512xf32>
    %4 = vector.shape_cast %3 : vector<512xf32> to vector<1x512xf32>
    %5 = arith.mulf %2, %2 : vector<128x512xf32>
    %cst_4 = arith.constant dense<0.000000e+00> : vector<512xf32>
    %6 = vector.multi_reduction <add>, %5, %cst_4 [0] : vector<128x512xf32> to vector<512xf32>
    %7 = vector.shape_cast %6 : vector<512xf32> to vector<1x512xf32>
    %cst_5 = arith.constant 0.000000e+00 : f32
    %8 = vector.broadcast %cst_5 : f32 to vector<6x512xf32>
    %9 = tpu.concatenate %4, %7, %8 in 0 : vector<1x512xf32>, vector<1x512xf32>, vector<6x512xf32> -> vector<8x512xf32>
    %c0_6 = arith.constant 0 : index
    %c0_7 = arith.constant 0 : index
    %10 = vector.load %arg3[%c0_6, %c0_7] : memref<8x512xf32, #tpu.memory_space<vmem>>, vector<8x512xf32>
    tpu.vector_store %arg3[%c0_6, %c0_7], %9 {strides = array<i32>} : memref<8x512xf32, #tpu.memory_space<vmem>>, vector<8x512xf32>,
    return
  }
  func.func @transform_0(%arg0: i32) -> (i32, i32) {
    %c0_i32 = arith.constant 0 : i32
    %c0_i32_0 = arith.constant 0 : i32
    return %arg0, %c0_i32 : i32, i32
  }
  func.func @transform_1(%arg0: i32) -> (i32, i32) {
    %c0_i32 = arith.constant 0 : i32
    %c0_i32_0 = arith.constant 0 : i32
    %c0_i32_1 = arith.constant 0 : i32
    return %c0_i32, %c0_i32_0 : i32, i32
  }
  func.func @transform_2(%arg0: i32) -> (i32, i32) {
    %c0_i32 = arith.constant 0 : i32
    %c0_i32_0 = arith.constant 0 : i32
    return %arg0, %c0_i32 : i32, i32
  }
}

</mosaic_0001>

<bundles_post_ra>
// kernel: tpu_custom_call.1
= control target key start
LH: loop header
LB: loop body
LE: loop exit
PB: predicated region body
PF: predicated region fallthrough
CT: control target
= control target key end

     0   :  { %7 = vsyncpa [#allocation3], 0  ;;  %s1323_s0 = inlined_call_operand.vmem [shape: f32[512,36], index: 0, kind: input, shape index: {}]   ;;  %s1324_s1 = inlined_call_operand.vmem [shape: f32[36,512], index: 1, kind: input, shape index: {}]   ;;  %s1325_s2 = inlined_call_operand.hbm [shape: f32[32,512], index: 2, kind: output, shape index: {}]  }
   0x1   :  { %9 = vsyncpa [#allocation3 + $0x1], 0  ;;  %s1070_s9 = smov 0   ;;  %s1072_s10 = smov 0  }
   0x2   :  { %s1074_s11 = smov 0   ;;  %s1076_s12 = smov 0  }
   0x3 LB: > { %s1091_s13 = sadd.s32 4294967295, %s1051_s12   ;;  %s884_s14 = sadd.s32 4294967294, %s1051_s12   ;;  %s1051_s12 = sphi %s1076_s12, %s1331_s12   ;;  %s1047_s11 = sphi %s1074_s11, %s1330_s11   ;;  %s1043_s10 = sphi %s1072_s10, %s1329_s10   ;;  %s1039_s9 = sphi %s1070_s9, %s1328_s9  }
   0x4   : > { %s1095_s15 = sadd.s32 1, %s1051_s12   ;;  %s69_s16 = sadd.s32 1, %s1047_s11 }
   0x5   : > { %s66_s17 = ssub.s32 %s1051_s12, %s1095_s15  ;;  %p79_p0 = scmp.ne.s32.totalorder %s1047_s11, %s1043_s10 }
   0x6   : > { %p67_p1 = scmp.eq.s32.totalorder %s66_s17, 0  ;;  %p80_p2 = scmp.eq.s32.totalorder %s1091_s13, 3 }
   0x7   : > { %p85_p3 = scmp.ne.s32.totalorder %s1043_s10, %s1039_s9  ;;  %p86_p4 = scmp.eq.s32.totalorder %s884_s14, 3 }
   0x8   : > { %s1106_s18 = scalar_select %p67_p1, %s1047_s11, %s69_s16  }
   0x9   : > { %p1108_p5 = por %p80_p2, %p79_p0  ;;  %p1112_p6 = por %p86_p4, %p85_p3 }
   0xa   : > { %p887_p7 = scmp.ge.s32.totalorder %s1051_s12, 1  ;;  %p116_p8 = scmp.lt.s32.totalorder %s1051_s12, 5 }
   0xc   : > { %p117_p9 = pnand %p887_p7, %p116_p8 }
   0xd   : > { %v161_v0 = vld [vmem:[%s1324_s1 + $0x8] sm:$0xff] (!%p117_p9)  ;;  %v163_v2 = vld [vmem:[%s1324_s1 + $0x18] sm:$0xff] (!%p117_p9)  ;;  %s889_s27 = sshll.u32 (!%p117_p9), %s1091_s13, 4  ;;  %v160_v5 = vld [vmem:[%s1324_s1] sm:$0xff] (!%p117_p9)  ;;  %v1053_v7 = vmov (!%p117_p9), 0.0   ;;  %vm229_vm0 = vcmask (!%p117_p9), 1043456  }
   0xe   : > { %120 = sbr.rel (%p117_p9) target bundleno = 333 (0x14d), region = 28  ;;  %v165_v1 = vld [vmem:[%s1324_s1 + $0x28] sm:$0xff] (!%p117_p9)  ;;  %v167_v4 = vld [vmem:[%s1324_s1 + $0x38] sm:$0xff] (!%p117_p9)  ;;  %v164_v6 = vld [vmem:[%s1324_s1 + $0x20] sm:$0xff] (!%p117_p9)  ;;  %306 = vmatprep.mubr.f32.mxu0 (!%p117_p9), %v1053_v7  ;;  %467 = vmatprep.mubr.f32.mxu1 (!%p117_p9), %v1053_v7  ;;  %p139_p10 = scmp.lt.s32.totalorder (!%p117_p9), %s889_s27, 63  ;;  %vm180_vm1 = vcmask (!%p117_p9), 293888  }
   0xf   : > { %v933_v3 = vpack.c.bf16 (!%p117_p9), %v165_v1, %v161_v0  ;;  %v941_v8 = vpack.c.bf16 (!%p117_p9), %v167_v4, %v163_v2  ;;  %v935_v9 = vpack.c.bf16 (!%p117_p9), %v164_v6, %v160_v5  ;;  %v162_v10 = vld [vmem:[%s1324_s1 + $0x10] sm:$0xff] (!%p117_p9)  ;;  %v169_v12 = vld [vmem:[%s1324_s1 + $0x48] sm:$0xff] (!%p117_p9)  ;;  %v171_v15 = vld [vmem:[%s1324_s1 + $0x58] sm:$0xff] (!%p117_p9)  ;;  %s135_s29 = sand.u32 (!%p117_p9), 1, %s1043_s10   ;;  %vm796_vm2 = vcmask (!%p117_p9), 1040384   ;;  %s932_s3 = sshll.u32 (!%p117_p9), %s1091_s13, 9 }
  0x10   : > { %v166_v11 = vld [vmem:[%s1324_s1 + $0x30] sm:$0xff] (!%p117_p9)  ;;  %v173_v14 = vld [vmem:[%s1324_s1 + $0x68] sm:$0xff] (!%p117_p9)  ;;  %v175_v16 = vld [vmem:[%s1324_s1 + $0x78] sm:$0xff] (!%p117_p9)  ;;  %s888_s30 = sshll.u32 (!%p117_p9), %s135_s29, 5  ;;  %vm801_vm3 = vcmask (!%p117_p9), 1041408   ;;  %s1278_s7 = scalar_lea.hbm (!%p117_p9), %s1325_s2, %s932_s3 }
  0x11   : > { %934 = vmatprep.subr.bf16.mxu0 (!%p117_p9), %v933_v3  ;;  %v943_v13 = vpack.c.bf16 (!%p117_p9), %v166_v11, %v162_v10  ;;  %942 = vmatprep.subr.bf16.mxu1 (!%p117_p9), %v941_v8  ;;  %v937_v17 = vpack.c.bf16 (!%p117_p9), %v173_v14, %v169_v12  ;;  %v945_v18 = vpack.c.bf16 (!%p117_p9), %v175_v16, %v171_v15  ;;  %v168_v19 = vld [vmem:[%s1324_s1 + $0x40] sm:$0xff] (!%p117_p9)  ;;  %v170_v21 = vld [vmem:[%s1324_s1 + $0x50] sm:$0xff] (!%p117_p9)  ;;  %v177_v25 = vld [vmem:[%s1324_s1 + $0x88] sm:$0xf] (!%p117_p9)  ;;  %s137_s4 = scalar_lea.vmem (!%p117_p9), [#allocation2], %s888_s30  ;;  %s1054_s16 = smov (!%p117_p9), [#allocation2]  }
  0x12   : > { %936 = vmatpush1.bf16.msra.mxu0 (!%p117_p9), %v935_v9  ;;  %v172_v20 = vld [vmem:[%s1324_s1 + $0x60] sm:$0xff] (!%p117_p9)  ;;  %v174_v23 = vld [vmem:[%s1324_s1 + $0x70] sm:$0xff] (!%p117_p9)  ;;  %v179_v26 = vld [vmem:[%s1324_s1 + $0x98] sm:$0xf] (!%p117_p9)  ;;  %s825_s5 = sshll.u32 (!%p117_p9), %s137_s4, 4  ;;  %s993_s17 = sshll.u32 (!%p117_p9), %s1054_s16, 4  ;;  %s1280_s5 = int_to_ptr.vmem [resolvable:$true] %s825_s5  ;;  %s994_s17 = int_to_ptr.vmem [resolvable:$false] %s993_s17 }
  0x13   : > { %944 = vmatpush1.bf16.msra.mxu1 (!%p117_p9), %v943_v13  ;;  %v939_v22 = vpack.c.bf16 (!%p117_p9), %v172_v20, %v168_v19  ;;  %938 = vmatprep.subr.bf16.mxu0 (!%p117_p9), %v937_v17  ;;  %v947_v24 = vpack.c.bf16 (!%p117_p9), %v174_v23, %v170_v21  ;;  %v176_v27 = vld [vmem:[%s1324_s1 + $0x80] sm:$0xf] (!%p117_p9)  ;;  %v178_v28 = vld [vmem:[%s1324_s1 + $0x90] sm:$0xf] (!%p117_p9)  ;;  %s989_s14 = scalar_lea.vmem (!%p117_p9), %s1280_s5, 512  ;;  %s995_s21 = scalar_lea.vmem (!%p117_p9), %s994_s17, 1024 }
  0x14   : > { %946 = vmatprep.subr.bf16.mxu1 (!%p117_p9), %v945_v18  ;;  %p990_p11 = scmp.ne.s32.totalorder (!%p117_p9), %s1280_s5, %s989_s14  ;;  %p996_p0 = scmp.lt.s32.totalorder (!%p117_p9), %s1280_s5, %s994_s17 }
  0x15   : > { %s1333_s27 = smov (!%p139_p10, %s889_s27), 63  ;;  %p997_p1 = scmp.lt.s32.totalorder %s995_s21, %s989_s14 }
  0x16   : > { %s890_s8 = sshll.u32 %s1333_s27, 3  ;;  %940 = vmatpush1.bf16.msra.mxu0 %v939_v22  ;;  %p991_p12 = pnand %p990_p11, %p1108_p5 }
  0x17   : > { %s1178_s24 = scalar_lea.vmem %s1323_s0, %s890_s8  ;;  %948 = vmatpush1.bf16.msra.mxu1 %v947_v24  ;;  %891 = vmatprep.subr.msk.mxu0 %vm229_vm0, %v177_v25  ;;  %s811_s8 = scalar_lea.sflag [#allocation3], %s135_s29 }
  0x18   : > { %909 = vmatprep.subr.msk.mxu1 %vm229_vm0, %v179_v26  ;;  %v144_v29 = vld [vmem:[%s1178_s24] sm:$0xff]  ;;  %v145_v30 = vld [vmem:[%s1178_s24 + $0x8] sm:$0xff]  ;;  %v146_v31 = vld [vmem:[%s1178_s24 + $0x10] sm:$0xff]  ;;  %p992_p13 = pneg %p991_p12  ;;  %p998_p2 = por %p997_p1, %p996_p0 }
  0x19   : > { %v147_v32 = vld [vmem:[%s1178_s24 + $0x18] sm:$0xff]  ;;  %v148_v33 = vld [vmem:[%s1178_s24 + $0x20] sm:$0xff]  ;;  %v149_v34 = vld [vmem:[%s1178_s24 + $0x28] sm:$0xff] }
  0x1a   : > { %892 = vmatpush1.msk.msra.mxu0 %vm229_vm0, %v176_v27  ;;  %v150_v35 = vld [vmem:[%s1178_s24 + $0x30] sm:$0xff]  ;;  %v151_v36 = vld [vmem:[%s1178_s24 + $0x38] sm:$0xff]  ;;  %v152_v37 = vld [vmem:[%s1178_s24 + $0x40] sm:$0xff]  ;;  %p999_p3 = pnand %p998_p2, %p992_p13 }
  0x1b   : > { %910 = vmatpush1.msk.msra.mxu1 %vm229_vm0, %v178_v28  ;;  %893 = vmatmul.mubr.msk.f32.vlgmr.msra.gmra.mrb[0].mxu0 %vm180_vm1, %v144_v29  ;;  %v153_v38 = vld [vmem:[%s1178_s24 + $0x48] sm:$0xff]  ;;  %v154_v39 = vld [vmem:[%s1178_s24 + $0x50] sm:$0xff]  ;;  %v155_v40 = vld [vmem:[%s1178_s24 + $0x58] sm:$0xff] }
  0x1c   : > { %911 = vmatmul.mubr.msk.f32.vlgmr.msra.gmra.mrb[0].mxu1 %vm180_vm1, %v144_v29  ;;  %312 = vmatprep.mubr.f32.mxu0 %v1053_v7  ;;  %v156_v41 = vld [vmem:[%s1178_s24 + $0x60] sm:$0xff]  ;;  %v157_v42 = vld [vmem:[%s1178_s24 + $0x68] sm:$0xff]  ;;  %v158_v43 = vld [vmem:[%s1178_s24 + $0x70] sm:$0xff] }
  0x1d   : > { %473 = vmatprep.mubr.f32.mxu1 %v1053_v7  ;;  %v159_v44 = vld [vmem:[%s1178_s24 + $0x78] sm:$0xff] }
  0x1f   : > { %894 = vmatmul.mubr.msk.f32.gmra.mrb[2].mxu0 %vm180_vm1, %v145_v30 }
  0x20   : > { %912 = vmatmul.mubr.msk.f32.gmra.mrb[2].mxu1 %vm180_vm1, %v145_v30  ;;  %318 = vmatprep.mubr.f32.mxu0 %v1053_v7 }
  0x21   : > { %479 = vmatprep.mubr.f32.mxu1 %v1053_v7 }
  0x23   : > { %895 = vmatmul.mubr.msk.f32.gmra.mrb[4].mxu0 %vm180_vm1, %v146_v31 }
  0x24   : > { %913 = vmatmul.mubr.msk.f32.gmra.mrb[4].mxu1 %vm180_vm1, %v146_v31  ;;  %324 = vmatprep.mubr.f32.mxu0 %v1053_v7 }
  0x25   : > { %485 = vmatprep.mubr.f32.mxu1 %v1053_v7 }
  0x27   : > { %896 = vmatmul.mubr.msk.f32.gmra.mrb[6].mxu0 %vm180_vm1, %v147_v32 }
  0x28   : > { %914 = vmatmul.mubr.msk.f32.gmra.mrb[6].mxu1 %vm180_vm1, %v147_v32  ;;  %330 = vmatprep.mubr.f32.mxu0 %v1053_v7 }
  0x29   : > { %491 = vmatprep.mubr.f32.mxu1 %v1053_v7 }
  0x2b   : > { %897 = vmatmul.mubr.msk.f32.gmra.mrb[8].mxu0 %vm180_vm1, %v148_v33 }
  0x2c   : > { %915 = vmatmul.mubr.msk.f32.gmra.mrb[8].mxu1 %vm180_vm1, %v148_v33  ;;  %336 = vmatprep.mubr.f32.mxu0 %v1053_v7 }
  0x2d   : > { %497 = vmatprep.mubr.f32.mxu1 %v1053_v7 }
  0x2f   : > { %898 = vmatmul.mubr.msk.f32.gmra.mrb[10].mxu0 %vm180_vm1, %v149_v34 }
  0x30   : > { %916 = vmatmul.mubr.msk.f32.gmra.mrb[10].mxu1 %vm180_vm1, %v149_v34  ;;  %342 = vmatprep.mubr.f32.mxu0 %v1053_v7 }
  0x31   : > { %503 = vmatprep.mubr.f32.mxu1 %v1053_v7 }
  0x33   : > { %899 = vmatmul.mubr.msk.f32.gmra.mrb[12].mxu0 %vm180_vm1, %v150_v35 }
  0x34   : > { %917 = vmatmul.mubr.msk.f32.gmra.mrb[12].mxu1 %vm180_vm1, %v150_v35  ;;  %348 = vmatprep.mubr.f32.mxu0 %v1053_v7 }
  0x35   : > { %509 = vmatprep.mubr.f32.mxu1 %v1053_v7 }
  0x37   : > { %900 = vmatmul.mubr.msk.f32.gmra.mrb[14].mxu0 %vm180_vm1, %v151_v36 }
  0x38   : > { %918 = vmatmul.mubr.msk.f32.gmra.mrb[14].mxu1 %vm180_vm1, %v151_v36  ;;  %354 = vmatprep.mubr.f32.mxu0 %v1053_v7 }
  0x39   : > { %515 = vmatprep.mubr.f32.mxu1 %v1053_v7 }
  0x3b   : > { %901 = vmatmul.mubr.msk.f32.gmra.mrb[16].mxu0 %vm180_vm1, %v152_v37 }
  0x3c   : > { %919 = vmatmul.mubr.msk.f32.gmra.mrb[16].mxu1 %vm180_vm1, %v152_v37  ;;  %360 = vmatprep.mubr.f32.mxu0 %v1053_v7 }
  0x3d   : > { %521 = vmatprep.mubr.f32.mxu1 %v1053_v7 }
  0x3f   : > { %902 = vmatmul.mubr.msk.f32.gmra.mrb[18].mxu0 %vm180_vm1, %v153_v38 }
  0x40   : > { %920 = vmatmul.mubr.msk.f32.gmra.mrb[18].mxu1 %vm180_vm1, %v153_v38  ;;  %366 = vmatprep.mubr.f32.mxu0 %v1053_v7 }
  0x41   : > { %527 = vmatprep.mubr.f32.mxu1 %v1053_v7 }
  0x43   : > { %903 = vmatmul.mubr.msk.f32.gmra.mrb[20].mxu0 %vm180_vm1, %v154_v39 }
  0x44   : > { %921 = vmatmul.mubr.msk.f32.gmra.mrb[20].mxu1 %vm180_vm1, %v154_v39  ;;  %372 = vmatprep.mubr.f32.mxu0 %v1053_v7 }
  0x45   : > { %533 = vmatprep.mubr.f32.mxu1 %v1053_v7 }
  0x47   : > { %904 = vmatmul.mubr.msk.f32.gmra.mrb[22].mxu0 %vm180_vm1, %v155_v40 }
  0x48   : > { %922 = vmatmul.mubr.msk.f32.gmra.mrb[22].mxu1 %vm180_vm1, %v155_v40  ;;  %378 = vmatprep.mubr.f32.mxu0 %v1053_v7 }
  0x49   : > { %539 = vmatprep.mubr.f32.mxu1 %v1053_v7 }
  0x4b   : > { %905 = vmatmul.mubr.msk.f32.gmra.mrb[24].mxu0 %vm180_vm1, %v156_v41 }
  0x4c   : > { %923 = vmatmul.mubr.msk.f32.gmra.mrb[24].mxu1 %vm180_vm1, %v156_v41  ;;  %384 = vmatprep.mubr.f32.mxu0 %v1053_v7 }
  0x4d   : > { %545 = vmatprep.mubr.f32.mxu1 %v1053_v7 }
  0x4f   : > { %906 = vmatmul.mubr.msk.f32.gmra.mrb[26].mxu0 %vm180_vm1, %v157_v42 }
  0x50   : > { %924 = vmatmul.mubr.msk.f32.gmra.mrb[26].mxu1 %vm180_vm1, %v157_v42  ;;  %390 = vmatprep.mubr.f32.mxu0 %v1053_v7 }
  0x51   : > { %551 = vmatprep.mubr.f32.mxu1 %v1053_v7 }
  0x53   : > { %907 = vmatmul.mubr.msk.f32.gmra.mrb[28].mxu0 %vm180_vm1, %v158_v43 }
  0x54   : > { %925 = vmatmul.mubr.msk.f32.gmra.mrb[28].mxu1 %vm180_vm1, %v158_v43  ;;  %396 = vmatprep.mubr.f32.mxu0 %v1053_v7 }
  0x55   : > { %557 = vmatprep.mubr.f32.mxu1 %v1053_v7 }
  0x57   : > { %908 = vmatmul.mubr.msk.f32.gmra.mrb[30].mxu0 %vm180_vm1, %v159_v44 }
  0x58   : > { %926 = vmatmul.mubr.msk.f32.gmra.mrb[30].mxu1 %vm180_vm1, %v159_v44 }
  0xee   : > { %v308_v45 = vpop.f32.mrb[0].mxu0 }
  0xef   : > { %v469_v46 = vpop.f32.mrb[0].mxu1  ;;  %v310_v47 = vpop.f32.mrb[1].mxu0  ;;  %v648_v49 = vmul.f32 %v308_v45, %v308_v45 }
  0xf0   : > { %v471_v48 = vpop.f32.mrb[1].mxu1  ;;  %v650_v51 = vmul.f32 %v469_v46, %v469_v46  ;;  %v649_v52 = vmul.f32 %v310_v47, %v310_v47 }
  0xf1   : > { %v651_v62 = vmul.f32 %v471_v48, %v471_v48 }
  0xf2   : > { %v314_v50 = vpop.f32.mrb[2].mxu0 }
  0xf3   : > { %v564_v53 = vadd.f32 %v314_v50, %v308_v45  ;;  %v652_v54 = vmul.f32 %v314_v50, %v314_v50  ;;  %v475_v55 = vpop.f32.mrb[2].mxu1  ;;  %v316_v56 = vpop.f32.mrb[3].mxu0 }
  0xf4   : > { %v606_v57 = vadd.f32 %v475_v55, %v469_v46  ;;  %v654_v58 = vmul.f32 %v475_v55, %v475_v55  ;;  %v585_v59 = vadd.f32 %v316_v56, %v310_v47  ;;  %v653_v60 = vmul.f32 %v316_v56, %v316_v56  ;;  %v477_v61 = vpop.f32.mrb[3].mxu1 }
  0xf5   : > { %v712_v63 = vadd.f32 %v652_v54, %v648_v49  ;;  %v627_v0 = vadd.f32 %v477_v61, %v471_v48  ;;  %v655_v1 = vmul.f32 %v477_v61, %v477_v61 }
  0xf6   : > { %v754_v2 = vadd.f32 %v654_v58, %v650_v51  ;;  %v733_v3 = vadd.f32 %v653_v60, %v649_v52  ;;  %v320_v4 = vpop.f32.mrb[4].mxu0 }
  0xf7   : > { %v775_v5 = vadd.f32 %v655_v1, %v651_v62  ;;  %v565_v6 = vadd.f32 %v564_v53, %v320_v4  ;;  %v656_v7 = vmul.f32 %v320_v4, %v320_v4  ;;  %v481_v8 = vpop.f32.mrb[4].mxu1  ;;  %v322_v9 = vpop.f32.mrb[5].mxu0 }
  0xf8   : > { %v607_v10 = vadd.f32 %v606_v57, %v481_v8  ;;  %v658_v11 = vmul.f32 %v481_v8, %v481_v8  ;;  %v586_v12 = vadd.f32 %v585_v59, %v322_v9  ;;  %v657_v13 = vmul.f32 %v322_v9, %v322_v9  ;;  %v483_v14 = vpop.f32.mrb[5].mxu1 }
  0xf9   : > { %v713_v15 = vadd.f32 %v712_v63, %v656_v7  ;;  %v628_v16 = vadd.f32 %v627_v0, %v483_v14  ;;  %v659_v17 = vmul.f32 %v483_v14, %v483_v14 }
  0xfa   : > { %v755_v18 = vadd.f32 %v754_v2, %v658_v11  ;;  %v734_v19 = vadd.f32 %v733_v3, %v657_v13  ;;  %v326_v20 = vpop.f32.mrb[6].mxu0 }
  0xfb   : > { %v776_v21 = vadd.f32 %v775_v5, %v659_v17  ;;  %v566_v22 = vadd.f32 %v565_v6, %v326_v20  ;;  %v660_v23 = vmul.f32 %v326_v20, %v326_v20  ;;  %v487_v24 = vpop.f32.mrb[6].mxu1  ;;  %v328_v25 = vpop.f32.mrb[7].mxu0 }
  0xfc   : > { %v608_v26 = vadd.f32 %v607_v10, %v487_v24  ;;  %v662_v27 = vmul.f32 %v487_v24, %v487_v24  ;;  %v587_v28 = vadd.f32 %v586_v12, %v328_v25  ;;  %v661_v29 = vmul.f32 %v328_v25, %v328_v25  ;;  %v489_v30 = vpop.f32.mrb[7].mxu1 }
  0xfd   : > { %v714_v31 = vadd.f32 %v713_v15, %v660_v23  ;;  %v629_v32 = vadd.f32 %v628_v16, %v489_v30  ;;  %v663_v33 = vmul.f32 %v489_v30, %v489_v30 }
  0xfe   : > { %v756_v34 = vadd.f32 %v755_v18, %v662_v27  ;;  %v735_v35 = vadd.f32 %v734_v19, %v661_v29  ;;  %v332_v36 = vpop.f32.mrb[8].mxu0 }
  0xff   : > { %v777_v37 = vadd.f32 %v776_v21, %v663_v33  ;;  %v567_v38 = vadd.f32 %v566_v22, %v332_v36  ;;  %v664_v39 = vmul.f32 %v332_v36, %v332_v36  ;;  %v493_v40 = vpop.f32.mrb[8].mxu1  ;;  %v334_v41 = vpop.f32.mrb[9].mxu0 }
 0x100   : > { %v609_v42 = vadd.f32 %v608_v26, %v493_v40  ;;  %v666_v43 = vmul.f32 %v493_v40, %v493_v40  ;;  %v588_v44 = vadd.f32 %v587_v28, %v334_v41  ;;  %v665_v45 = vmul.f32 %v334_v41, %v334_v41  ;;  %v495_v46 = vpop.f32.mrb[9].mxu1 }
 0x101   : > { %v715_v47 = vadd.f32 %v714_v31, %v664_v39  ;;  %v630_v48 = vadd.f32 %v629_v32, %v495_v46  ;;  %v667_v49 = vmul.f32 %v495_v46, %v495_v46 }
 0x102   : > { %v757_v50 = vadd.f32 %v756_v34, %v666_v43  ;;  %v736_v51 = vadd.f32 %v735_v35, %v665_v45  ;;  %v338_v52 = vpop.f32.mrb[10].mxu0 }
 0x103   : > { %v778_v53 = vadd.f32 %v777_v37, %v667_v49  ;;  %v568_v54 = vadd.f32 %v567_v38, %v338_v52  ;;  %v668_v55 = vmul.f32 %v338_v52, %v338_v52  ;;  %v499_v56 = vpop.f32.mrb[10].mxu1  ;;  %v340_v57 = vpop.f32.mrb[11].mxu0 }
 0x104   : > { %v610_v58 = vadd.f32 %v609_v42, %v499_v56  ;;  %v670_v59 = vmul.f32 %v499_v56, %v499_v56  ;;  %v589_v60 = vadd.f32 %v588_v44, %v340_v57  ;;  %v669_v61 = vmul.f32 %v340_v57, %v340_v57  ;;  %v501_v62 = vpop.f32.mrb[11].mxu1 }
 0x105   : > { %v716_v63 = vadd.f32 %v715_v47, %v668_v55  ;;  %v631_v0 = vadd.f32 %v630_v48, %v501_v62  ;;  %v671_v1 = vmul.f32 %v501_v62, %v501_v62 }
 0x106   : > { %v758_v2 = vadd.f32 %v757_v50, %v670_v59  ;;  %v737_v3 = vadd.f32 %v736_v51, %v669_v61  ;;  %v344_v4 = vpop.f32.mrb[12].mxu0 }
 0x107   : > { %v779_v5 = vadd.f32 %v778_v53, %v671_v1  ;;  %v569_v6 = vadd.f32 %v568_v54, %v344_v4  ;;  %v672_v7 = vmul.f32 %v344_v4, %v344_v4  ;;  %v505_v8 = vpop.f32.mrb[12].mxu1  ;;  %v346_v9 = vpop.f32.mrb[13].mxu0 }
 0x108   : > { %v611_v10 = vadd.f32 %v610_v58, %v505_v8  ;;  %v674_v11 = vmul.f32 %v505_v8, %v505_v8  ;;  %v590_v12 = vadd.f32 %v589_v60, %v346_v9  ;;  %v673_v13 = vmul.f32 %v346_v9, %v346_v9  ;;  %v507_v14 = vpop.f32.mrb[13].mxu1 }
 0x109   : > { %v717_v15 = vadd.f32 %v716_v63, %v672_v7  ;;  %v632_v16 = vadd.f32 %v631_v0, %v507_v14  ;;  %v675_v17 = vmul.f32 %v507_v14, %v507_v14 }
 0x10a   : > { %v759_v18 = vadd.f32 %v758_v2, %v674_v11  ;;  %v738_v19 = vadd.f32 %v737_v3, %v673_v13  ;;  %v350_v20 = vpop.f32.mrb[14].mxu0 }
 0x10b   : > { %v780_v21 = vadd.f32 %v779_v5, %v675_v17  ;;  %v570_v22 = vadd.f32 %v569_v6, %v350_v20  ;;  %v676_v23 = vmul.f32 %v350_v20, %v350_v20  ;;  %v511_v24 = vpop.f32.mrb[14].mxu1  ;;  %v352_v25 = vpop.f32.mrb[15].mxu0 }
 0x10c   : > { %v612_v26 = vadd.f32 %v611_v10, %v511_v24  ;;  %v678_v27 = vmul.f32 %v511_v24, %v511_v24  ;;  %v591_v28 = vadd.f32 %v590_v12, %v352_v25  ;;  %v677_v29 = vmul.f32 %v352_v25, %v352_v25  ;;  %v513_v30 = vpop.f32.mrb[15].mxu1 }
 0x10d   : > { %v718_v31 = vadd.f32 %v717_v15, %v676_v23  ;;  %v633_v32 = vadd.f32 %v632_v16, %v513_v30  ;;  %v679_v33 = vmul.f32 %v513_v30, %v513_v30 }
 0x10e   : > { %v760_v34 = vadd.f32 %v759_v18, %v678_v27  ;;  %v739_v35 = vadd.f32 %v738_v19, %v677_v29  ;;  %v356_v36 = vpop.f32.mrb[16].mxu0 }
 0x10f   : > { %v781_v37 = vadd.f32 %v780_v21, %v679_v33  ;;  %v571_v38 = vadd.f32 %v570_v22, %v356_v36  ;;  %v680_v39 = vmul.f32 %v356_v36, %v356_v36  ;;  %v517_v40 = vpop.f32.mrb[16].mxu1  ;;  %v358_v41 = vpop.f32.mrb[17].mxu0 }
 0x110   : > { %v613_v42 = vadd.f32 %v612_v26, %v517_v40  ;;  %v682_v43 = vmul.f32 %v517_v40, %v517_v40  ;;  %v592_v44 = vadd.f32 %v591_v28, %v358_v41  ;;  %v681_v45 = vmul.f32 %v358_v41, %v358_v41  ;;  %v519_v46 = vpop.f32.mrb[17].mxu1 }
 0x111   : > { %v719_v47 = vadd.f32 %v718_v31, %v680_v39  ;;  %v634_v48 = vadd.f32 %v633_v32, %v519_v46  ;;  %v683_v49 = vmul.f32 %v519_v46, %v519_v46 }
 0x112   : > { %v761_v50 = vadd.f32 %v760_v34, %v682_v43  ;;  %v740_v51 = vadd.f32 %v739_v35, %v681_v45  ;;  %v362_v52 = vpop.f32.mrb[18].mxu0 }
 0x113   : > { %v782_v53 = vadd.f32 %v781_v37, %v683_v49  ;;  %v572_v54 = vadd.f32 %v571_v38, %v362_v52  ;;  %v684_v55 = vmul.f32 %v362_v52, %v362_v52  ;;  %v523_v56 = vpop.f32.mrb[18].mxu1  ;;  %v364_v57 = vpop.f32.mrb[19].mxu0 }
 0x114   : > { %v614_v58 = vadd.f32 %v613_v42, %v523_v56  ;;  %v686_v59 = vmul.f32 %v523_v56, %v523_v56  ;;  %v593_v60 = vadd.f32 %v592_v44, %v364_v57  ;;  %v685_v61 = vmul.f32 %v364_v57, %v364_v57  ;;  %v525_v62 = vpop.f32.mrb[19].mxu1 }
 0x115   : > { %v720_v63 = vadd.f32 %v719_v47, %v684_v55  ;;  %v635_v0 = vadd.f32 %v634_v48, %v525_v62  ;;  %v687_v1 = vmul.f32 %v525_v62, %v525_v62 }
 0x116   : > { %v762_v2 = vadd.f32 %v761_v50, %v686_v59  ;;  %v741_v3 = vadd.f32 %v740_v51, %v685_v61  ;;  %v368_v4 = vpop.f32.mrb[20].mxu0 }
 0x117   : > { %v783_v5 = vadd.f32 %v782_v53, %v687_v1  ;;  %v573_v6 = vadd.f32 %v572_v54, %v368_v4  ;;  %v688_v7 = vmul.f32 %v368_v4, %v368_v4  ;;  %v529_v8 = vpop.f32.mrb[20].mxu1  ;;  %v370_v9 = vpop.f32.mrb[21].mxu0 }
 0x118   : > { %v615_v10 = vadd.f32 %v614_v58, %v529_v8  ;;  %v690_v11 = vmul.f32 %v529_v8, %v529_v8  ;;  %v594_v12 = vadd.f32 %v593_v60, %v370_v9  ;;  %v689_v13 = vmul.f32 %v370_v9, %v370_v9  ;;  %v531_v14 = vpop.f32.mrb[21].mxu1 }
 0x119   : > { %v721_v15 = vadd.f32 %v720_v63, %v688_v7  ;;  %v636_v16 = vadd.f32 %v635_v0, %v531_v14  ;;  %v691_v17 = vmul.f32 %v531_v14, %v531_v14 }
 0x11a   : > { %v763_v18 = vadd.f32 %v762_v2, %v690_v11  ;;  %v742_v19 = vadd.f32 %v741_v3, %v689_v13  ;;  %v374_v20 = vpop.f32.mrb[22].mxu0 }
 0x11b   : > { %v784_v21 = vadd.f32 %v783_v5, %v691_v17  ;;  %v574_v22 = vadd.f32 %v573_v6, %v374_v20  ;;  %v692_v23 = vmul.f32 %v374_v20, %v374_v20  ;;  %v535_v24 = vpop.f32.mrb[22].mxu1  ;;  %v376_v25 = vpop.f32.mrb[23].mxu0 }
 0x11c   : > { %v616_v26 = vadd.f32 %v615_v10, %v535_v24  ;;  %v694_v27 = vmul.f32 %v535_v24, %v535_v24  ;;  %v595_v28 = vadd.f32 %v594_v12, %v376_v25  ;;  %v693_v29 = vmul.f32 %v376_v25, %v376_v25  ;;  %v537_v30 = vpop.f32.mrb[23].mxu1 }
 0x11d   : > { %v722_v31 = vadd.f32 %v721_v15, %v692_v23  ;;  %v637_v32 = vadd.f32 %v636_v16, %v537_v30  ;;  %v695_v33 = vmul.f32 %v537_v30, %v537_v30 }
 0x11e   : > { %v764_v34 = vadd.f32 %v763_v18, %v694_v27  ;;  %v743_v35 = vadd.f32 %v742_v19, %v693_v29  ;;  %v380_v36 = vpop.f32.mrb[24].mxu0 }
 0x11f   : > { %v785_v37 = vadd.f32 %v784_v21, %v695_v33  ;;  %v575_v38 = vadd.f32 %v574_v22, %v380_v36  ;;  %v696_v39 = vmul.f32 %v380_v36, %v380_v36  ;;  %v541_v40 = vpop.f32.mrb[24].mxu1  ;;  %v382_v41 = vpop.f32.mrb[25].mxu0 }
 0x120   : > { %v617_v42 = vadd.f32 %v616_v26, %v541_v40  ;;  %v698_v43 = vmul.f32 %v541_v40, %v541_v40  ;;  %v596_v44 = vadd.f32 %v595_v28, %v382_v41  ;;  %v697_v45 = vmul.f32 %v382_v41, %v382_v41  ;;  %v543_v46 = vpop.f32.mrb[25].mxu1 }
 0x121   : > { %v723_v47 = vadd.f32 %v722_v31, %v696_v39  ;;  %v638_v48 = vadd.f32 %v637_v32, %v543_v46  ;;  %v699_v49 = vmul.f32 %v543_v46, %v543_v46 }
 0x122   : > { %v765_v50 = vadd.f32 %v764_v34, %v698_v43  ;;  %v744_v51 = vadd.f32 %v743_v35, %v697_v45  ;;  %v386_v52 = vpop.f32.mrb[26].mxu0 }
 0x123   : > { %v786_v53 = vadd.f32 %v785_v37, %v699_v49  ;;  %v576_v54 = vadd.f32 %v575_v38, %v386_v52  ;;  %v700_v55 = vmul.f32 %v386_v52, %v386_v52  ;;  %v547_v56 = vpop.f32.mrb[26].mxu1  ;;  %v388_v57 = vpop.f32.mrb[27].mxu0 }
 0x124   : > { %v618_v58 = vadd.f32 %v617_v42, %v547_v56  ;;  %v702_v59 = vmul.f32 %v547_v56, %v547_v56  ;;  %v597_v60 = vadd.f32 %v596_v44, %v388_v57  ;;  %v701_v61 = vmul.f32 %v388_v57, %v388_v57  ;;  %v549_v62 = vpop.f32.mrb[27].mxu1 }
 0x125   : > { %v724_v63 = vadd.f32 %v723_v47, %v700_v55  ;;  %v639_v0 = vadd.f32 %v638_v48, %v549_v62  ;;  %v703_v1 = vmul.f32 %v549_v62, %v549_v62 }
 0x126   : > { %v766_v2 = vadd.f32 %v765_v50, %v702_v59  ;;  %v745_v3 = vadd.f32 %v744_v51, %v701_v61  ;;  %v392_v4 = vpop.f32.mrb[28].mxu0 }
 0x127   : > { %v787_v5 = vadd.f32 %v786_v53, %v703_v1  ;;  %v577_v6 = vadd.f32 %v576_v54, %v392_v4  ;;  %v704_v7 = vmul.f32 %v392_v4, %v392_v4  ;;  %v553_v8 = vpop.f32.mrb[28].mxu1  ;;  %v394_v9 = vpop.f32.mrb[29].mxu0 }
 0x128   : > { %v619_v10 = vadd.f32 %v618_v58, %v553_v8  ;;  %v706_v11 = vmul.f32 %v553_v8, %v553_v8  ;;  %v598_v12 = vadd.f32 %v597_v60, %v394_v9  ;;  %v705_v13 = vmul.f32 %v394_v9, %v394_v9  ;;  %v555_v14 = vpop.f32.mrb[29].mxu1 }
 0x129   : > { %v725_v15 = vadd.f32 %v724_v63, %v704_v7  ;;  %v640_v16 = vadd.f32 %v639_v0, %v555_v14  ;;  %v707_v17 = vmul.f32 %v555_v14, %v555_v14 }
 0x12a   : > { %v767_v18 = vadd.f32 %v766_v2, %v706_v11  ;;  %v746_v19 = vadd.f32 %v745_v3, %v705_v13  ;;  %v398_v20 = vpop.f32.mrb[30].mxu0 }
 0x12b   : > { %v788_v21 = vadd.f32 %v787_v5, %v707_v17  ;;  %v578_v22 = vadd.f32 %v577_v6, %v398_v20  ;;  %v708_v23 = vmul.f32 %v398_v20, %v398_v20  ;;  %v559_v24 = vpop.f32.mrb[30].mxu1  ;;  %v400_v25 = vpop.f32.mrb[31].mxu0 }
 0x12c   : > { %v620_v26 = vadd.f32 %v619_v10, %v559_v24  ;;  %v710_v27 = vmul.f32 %v559_v24, %v559_v24  ;;  %v599_v28 = vadd.f32 %v598_v12, %v400_v25  ;;  %v709_v29 = vmul.f32 %v400_v25, %v400_v25  ;;  %v561_v30 = vpop.f32.mrb[31].mxu1 }
 0x12d   : > { %v579_v31 = vrot.slane %v578_v22, 4  ;;  %v726_v32 = vadd.f32 %v725_v15, %v708_v23  ;;  %v641_v33 = vadd.f32 %v640_v16, %v561_v30  ;;  %v711_v34 = vmul.f32 %v561_v30, %v561_v30 }
 0x12e   : > { %v621_v35 = vrot.slane %v620_v26, 4  ;;  %v768_v36 = vadd.f32 %v767_v18, %v710_v27  ;;  %v600_v37 = vrot.slane %v599_v28, 4  ;;  %v747_v38 = vadd.f32 %v746_v19, %v709_v29 }
 0x12f   : > { %v580_v39 = vadd.f32 %v579_v31, %v578_v22  ;;  %v727_v40 = vrot.slane %v726_v32, 4  ;;  %v642_v41 = vrot.slane %v641_v33, 4  ;;  %v789_v42 = vadd.f32 %v788_v21, %v711_v34 }
 0x130   : > { %v622_v43 = vadd.f32 %v621_v35, %v620_v26  ;;  %v769_v44 = vrot.slane %v768_v36, 4  ;;  %v601_v45 = vadd.f32 %v600_v37, %v599_v28  ;;  %v748_v46 = vrot.slane %v747_v38, 4 }
 0x131   : > { %v581_v47 = vrot.slane %v580_v39, 2  ;;  %v728_v48 = vadd.f32 %v727_v40, %v726_v32  ;;  %v643_v49 = vadd.f32 %v642_v41, %v641_v33  ;;  %v790_v50 = vrot.slane %v789_v42, 4 }
 0x132   : > { %v623_v51 = vrot.slane %v622_v43, 2  ;;  %v770_v52 = vadd.f32 %v769_v44, %v768_v36  ;;  %v602_v53 = vrot.slane %v601_v45, 2  ;;  %v749_v54 = vadd.f32 %v748_v46, %v747_v38 }
 0x133   : > { %v582_v55 = vadd.f32 %v581_v47, %v580_v39  ;;  %v729_v56 = vrot.slane %v728_v48, 2  ;;  %v644_v57 = vrot.slane %v643_v49, 2  ;;  %v791_v58 = vadd.f32 %v790_v50, %v789_v42 }
 0x134   : > { %v624_v59 = vadd.f32 %v623_v51, %v622_v43  ;;  %v771_v60 = vrot.slane %v770_v52, 2  ;;  %v603_v61 = vadd.f32 %v602_v53, %v601_v45  ;;  %v750_v62 = vrot.slane %v749_v54, 2 }
 0x135   : > { %v583_v63 = vrot.slane %v582_v55, 1  ;;  %v730_v0 = vadd.f32 %v729_v56, %v728_v48  ;;  %v645_v1 = vadd.f32 %v644_v57, %v643_v49  ;;  %v792_v2 = vrot.slane %v791_v58, 2 }
 0x136   : > { %v625_v3 = vrot.slane %v624_v59, 1  ;;  %v772_v4 = vadd.f32 %v771_v60, %v770_v52  ;;  %v604_v5 = vrot.slane %v603_v61, 1  ;;  %v751_v6 = vadd.f32 %v750_v62, %v749_v54 }
 0x137   : > { %v731_v7 = vrot.slane %v730_v0, 1  ;;  %v646_v8 = vrot.slane %v645_v1, 1  ;;  %v793_v9 = vadd.f32 %v792_v2, %v791_v58  ;;  %v584_v12 = vadd.f32 %v583_v63, %v582_v55 }
 0x138   : > { %v773_v10 = vrot.slane %v772_v4, 1  ;;  %v752_v11 = vrot.slane %v751_v6, 1  ;;  %v626_v15 = vadd.f32 %v625_v3, %v624_v59  ;;  %v605_v17 = vadd.f32 %v604_v5, %v603_v61 }
 0x139   : > { %v732_v13 = vadd.f32 %v731_v7, %v730_v0  ;;  %v794_v14 = vrot.slane %v793_v9, 1  ;;  %v647_v20 = vadd.f32 %v646_v8, %v645_v1 }
 0x13a   : > { %v774_v16 = vadd.f32 %v773_v10, %v772_v4  ;;  %v753_v18 = vadd.f32 %v752_v11, %v751_v6 }
 0x13b   : > { %v797_v19 = vsel %vm796_vm2, %v584_v12, %v732_v13  ;;  %v795_v21 = vadd.f32 %v794_v14, %v793_v9 }
 0x13c   : > { %v799_v22 = vsel %vm796_vm2, %v626_v15, %v774_v16  ;;  %v798_v23 = vsel %vm796_vm2, %v605_v17, %v753_v18  ;;  %v802_v24 = vsel %vm801_vm3, %v797_v19, 0.0 }
 0x13d   : > { %v803_v25 = vsel %vm801_vm3, %v798_v23, 0.0  ;;  %v800_v26 = vsel %vm796_vm2, %v647_v20, %v795_v21  ;;  %v804_v27 = vsel %vm801_vm3, %v799_v22, 0.0  ;;  %806 = vst [vmem:[%s137_s4] sm:$0xff] %v802_v24 }
 0x13e   : > { %v805_v28 = vsel %vm801_vm3, %v800_v26, 0.0  ;;  %807 = vst [vmem:[%s137_s4 + $0x8] sm:$0xff] %v803_v25  ;;  %808 = vst [vmem:[%s137_s4 + $0x10] sm:$0xff] %v804_v27 }
 0x13f   : > { %809 = vst [vmem:[%s137_s4 + $0x18] sm:$0xff] %v805_v28 }
 0x140   : > { %1002 = shalt.err (!%p999_p3)
}
 0x141   : > { %s1003_s22 = scalar_lea.hbm %s1278_s7, 512  ;;  %s1007_s27 = scalar_lea.hbm %s1325_s2, 2048 }
 0x142   : > { %p1004_p4 = scmp.ne.s32.totalorder %s1278_s7, %s1003_s22  ;;  %p1008_p9 = scmp.lt.u32.totalorder %s1278_s7, %s1325_s2 }
 0x143   : > { %p1009_p10 = scmp.lt.u32.totalorder %s1007_s27, %s1003_s22  ;;  %p1011_p12 = scmp.lt.u32.totalorder %s1003_s22, %s1278_s7 }
 0x144   : > { %p1005_p7 = pnand %p1004_p4, %p1108_p5 }
 0x145   : > { %p1010_p11 = por %p1009_p10, %p1008_p9 }
 0x146   : > { %p1006_p8 = pneg %p1005_p7 }
 0x147   : > { %p1012_p13 = por %p1011_p12, %p1010_p11 }
 0x149   : > { %p1013_p0 = pnand %p1012_p13, %p1006_p8 }
 0x14b   : > { %1016 = shalt.err (!%p1013_p0)
}
 0x14c   : > { %949 = dma.vmem_to_hbm [thread:$0]  (%p1108_p5), %s1280_s5, 512, %s1278_s7, %s811_s8  }
 0x14d PF: > { %p955_p1 = scmp.ge.s32.totalorder %s1051_s12, 2  ;;  %s837_s28 = sand.u32 1, %s1039_s9  }
 0x14e   : > { %s838_s29 = scalar_lea.sflag [#allocation3], %s837_s28 }
 0x14f   : > { %p952_p2 = pnand %p955_p1, %p1112_p6 }
 0x151   : > { %1034 = dma.done.wait (!%p952_p2), %s838_s29, 512  }
 0x152   : > { %1036 = vsyncadd (!%p952_p2), %s838_s29, 4294966784  ;;  %p12_p3 = scmp.ge.s32.totalorder %s1095_s15, 6   ;;  %s1328_s9 = smov %s1043_s10 }
 0x153   : > { %s1329_s10 = smov %s1047_s11  ;;  %s1330_s11 = smov %s1106_s18 }
 0x154   : > { %s1331_s12 = smov %s1095_s15  ;;  %14 = sbr.rel (!%p12_p3) target bundleno = 3 (0x3), region = 63 }
 0x15b   :  { %843 = vsyncpa [#allocation3], 1 }
 0x15c   :  { %845 = vsyncpa [#allocation3 + $0x1], 1 }

</bundles_post_ra>
